<compile_context>
chip_gen: v7x
topology: tpu7x:2x2x1
jax: 0.10.0
libtpu: 0.0.40
codegen_flags: <defaults>
</compile_context>

<pallas_src>
import functools

import jax
import jax.numpy as jnp
from jax.experimental import pallas as pl
from jax.experimental.pallas import tpu as pltpu


def _offset_kernel(n_sets, *refs):
    """Fused OffsetSet forward for one batch tile.

    refs layout: e_1..e_n, e_o_1..e_o_n, pre_top, pre_bot, post, out
    """
    e_refs = refs[:n_sets]
    eo_refs = refs[n_sets:2 * n_sets]
    pre_top_ref, pre_bot_ref, post_ref, out_ref = refs[2 * n_sets:]

    bm = e_refs[0].shape[0]

    # Stack the n_sets LHS operands on the sublane (row) axis so each weight
    # half hits the MXU exactly once. This is a VMEM/vreg layout op, not an
    # HBM concat.
    e_all = jnp.concatenate([r[...] for r in e_refs], axis=0)    # (n*bm, E)
    eo_all = jnp.concatenate([r[...] for r in eo_refs], axis=0)  # (n*bm, E)

    # relu(concat([e, e_o]) @ pre_mats) == relu(e @ pre_top + e_o @ pre_bot)
    h = jnp.dot(e_all, pre_top_ref[...], preferred_element_type=jnp.float32)
    h = h + jnp.dot(eo_all, pre_bot_ref[...], preferred_element_type=jnp.float32)
    h = jnp.maximum(h, 0.0)                                      # (n*bm, M)

    # agg_func = torch.min over the stacked set axis (cheap VPU min).
    comb = h[0:bm]
    for s in range(1, n_sets):
        comb = jnp.minimum(comb, h[s * bm:(s + 1) * bm])

    out_ref[...] = jnp.dot(
        comb, post_ref[...], preferred_element_type=jnp.float32
    ).astype(out_ref.dtype)


@jax.jit
def offset_set_forward(embeds1, embeds1_o, embeds2, embeds2_o,
                       pre_mats, post_mats,
                       embeds3=None, embeds3_o=None):
    """JAX/Pallas equivalent of OffsetSet.forward with agg_func=torch.min."""
    has_three = embeds3 is not None and embeds3_o is not None
    e_list = [embeds1, embeds2] + ([embeds3] if has_three else [])
    eo_list = [embeds1_o, embeds2_o] + ([embeds3_o] if has_three else [])
    n_sets = len(e_list)

    B, E = embeds1.shape            # batch, expand_dims
    M = pre_mats.shape[1]           # mode_dims
    out_E = post_mats.shape[1]      # expand_dims (output width)

    # Split pre_mats once (tiny weight slice) so no (B, 2E) activation concat
    # ever materializes in HBM.
    pre_top = pre_mats[:E, :]
    pre_bot = pre_mats[E:, :]

    # Tile the batch axis: block height must be a multiple of 8 or the full dim.
    # Small batches run as a single grid step; large batches pipeline and, on
    # v7x, shard across both TensorCores via the "parallel" axis.
    bm = B if B <= 512 else 512
    grid = (pl.cdiv(B, bm),)

    e_spec = pl.BlockSpec((bm, E), lambda i: (i, 0))
    pre_spec = pl.BlockSpec((E, M), lambda i: (0, 0))
    post_spec = pl.BlockSpec((M, out_E), lambda i: (0, 0))
    # TODO(synk): if out_E stays < 128 and the consumer can read a padded slab,
    # zero-pad post_mats columns to 128 for unmasked lane-dense stores.
    out_spec = pl.BlockSpec((bm, out_E), lambda i: (i, 0))

    flops = 4 * n_sets * B * E * M + 2 * B * M * out_E + 2 * n_sets * B * M
    bytes_accessed = 4 * (2 * n_sets * B * E + 2 * E * M + M * out_E + B * out_E)

    return pl.pallas_call(
        functools.partial(_offset_kernel, n_sets),
        out_shape=jax.ShapeDtypeStruct((B, out_E), embeds1.dtype),
        grid=grid,
        in_specs=[e_spec] * n_sets + [e_spec] * n_sets
                 + [pre_spec, pre_spec, post_spec],
        out_specs=out_spec,
        compiler_params=pltpu.CompilerParams(
            dimension_semantics=("parallel",)),
        cost_estimate=pl.CostEstimate(
            flops=flops, transcendentals=0, bytes_accessed=bytes_accessed),
    )(*e_list, *eo_list, pre_top, pre_bot, post_mats)


def xavier_uniform(key, shape, dtype=jnp.float32):
    """Deterministic Xavier/Glorot uniform init (matches nn.init.xavier_uniform)."""
    fan_in, fan_out = shape[0], shape[1]
    limit = (6.0 / (fan_in + fan_out)) ** 0.5
    return jax.random.uniform(key, shape, dtype=dtype, minval=-limit, maxval=limit)


if __name__ == "__main__":
    # Small shapes consistent with the module: B=8, expand_dims=32, mode_dims=32.
    B = 8
    expand_dims = 32
    mode_dims = 32

    key = jax.random.PRNGKey(0)
    k = jax.random.split(key, 8)

    pre_mats = xavier_uniform(k[0], (expand_dims * 2, mode_dims))
    post_mats = xavier_uniform(k[1], (mode_dims, expand_dims))

    embeds1 = jax.random.normal(k[2], (B, expand_dims), dtype=jnp.float32)
    embeds1_o = jax.random.normal(k[3], (B, expand_dims), dtype=jnp.float32)
    embeds2 = jax.random.normal(k[4], (B, expand_dims), dtype=jnp.float32)
    embeds2_o = jax.random.normal(k[5], (B, expand_dims), dtype=jnp.float32)
    embeds3 = jax.random.normal(k[6], (B, expand_dims), dtype=jnp.float32)
    embeds3_o = jax.random.normal(k[7], (B, expand_dims), dtype=jnp.float32)

    # Pure-JAX reference (mirrors the PyTorch forward exactly).
    def ref(e1, e1o, e2, e2o, e3=None, e3o=None):
        t1 = jnp.maximum(jnp.concatenate([e1, e1o], 1) @ pre_mats, 0.0)
        t2 = jnp.maximum(jnp.concatenate([e2, e2o], 1) @ pre_mats, 0.0)
        if e3 is not None:
            t3 = jnp.maximum(jnp.concatenate([e3, e3o], 1) @ pre_mats, 0.0)
            comb = jnp.min(jnp.stack([t1, t2, t3]), axis=0)
        else:
            comb = jnp.min(jnp.stack([t1, t2]), axis=0)
        return comb @ post_mats

    # 2-input path
    out2 = offset_set_forward(embeds1, embeds1_o, embeds2, embeds2_o,
                              pre_mats, post_mats)
    jax.block_until_ready(out2)
    ref2 = ref(embeds1, embeds1_o, embeds2, embeds2_o)
    assert out2.shape == (B, expand_dims)
    assert jnp.allclose(out2, ref2, atol=1e-4, rtol=1e-4)

    # 3-input path
    out3 = offset_set_forward(embeds1, embeds1_o, embeds2, embeds2_o,
                              pre_mats, post_mats, embeds3, embeds3_o)
    jax.block_until_ready(out3)
    ref3 = ref(embeds1, embeds1_o, embeds2, embeds2_o, embeds3, embeds3_o)
    assert out3.shape == (B, expand_dims)
    assert jnp.allclose(out3, ref3, atol=1e-4, rtol=1e-4)

    print("KERNEL_OK")
</pallas_src>

<mosaic_0001>
module attributes {stable_mosaic.version = 11 : i64} {
  func.func @_offset_kernel(%arg0: i32, %arg1: memref<8x32xf32, #tpu.memory_space<vmem>>, %arg2: memref<8x32xf32, #tpu.memory_space<vmem>>, %arg3: memref<8x32xf32, #tpu.memory_space<vmem>>, %arg4: memref<8x32xf32, #tpu.memory_space<vmem>>, %arg5: memref<32x32xf32, #tpu.memory_space<vmem>>, %arg6: memref<32x32xf32, #tpu.memory_space<vmem>>, %arg7: memref<32x32xf32, #tpu.memory_space<vmem>>, %arg8: memref<8x32xf32, #tpu.memory_space<vmem>>) attributes {dimension_semantics = [#tpu.dimension_semantics<parallel>], iteration_bounds = array<i64: 1>, scalar_prefetch = 0 : i64, scratch_operands = 0 : i64, tpu.core_type = #tpu.core_type<tc>, window_params = [{transform_indices = @transform_0, window_bounds = array<i64: 8, 32>}, {transform_indices = @transform_1, window_bounds = array<i64: 8, 32>}, {transform_indices = @transform_2, window_bounds = array<i64: 8, 32>}, {transform_indices = @transform_3, window_bounds = array<i64: 8, 32>}, {pipeline_mode = #tpu.pipeline_mode<synchronous>, transform_indices = @transform_4, window_bounds = array<i64: 32, 32>}, {pipeline_mode = #tpu.pipeline_mode<synchronous>, transform_indices = @transform_5, window_bounds = array<i64: 32, 32>}, {pipeline_mode = #tpu.pipeline_mode<synchronous>, transform_indices = @transform_6, window_bounds = array<i64: 32, 32>}, {transform_indices = @transform_7, window_bounds = array<i64: 8, 32>}]} {
    %c0 = arith.constant 0 : index
    %c0_0 = arith.constant 0 : index
    %0 = vector.load %arg1[%c0, %c0_0] : memref<8x32xf32, #tpu.memory_space<vmem>>, vector<8x32xf32>
    %c0_1 = arith.constant 0 : index
    %c0_2 = arith.constant 0 : index
    %1 = vector.load %arg2[%c0_1, %c0_2] : memref<8x32xf32, #tpu.memory_space<vmem>>, vector<8x32xf32>
    %2 = tpu.concatenate %0, %1 in 0 : vector<8x32xf32>, vector<8x32xf32> -> vector<16x32xf32>
    %c0_3 = arith.constant 0 : index
    %c0_4 = arith.constant 0 : index
    %3 = vector.load %arg3[%c0_3, %c0_4] : memref<8x32xf32, #tpu.memory_space<vmem>>, vector<8x32xf32>
    %c0_5 = arith.constant 0 : index
    %c0_6 = arith.constant 0 : index
    %4 = vector.load %arg4[%c0_5, %c0_6] : memref<8x32xf32, #tpu.memory_space<vmem>>, vector<8x32xf32>
    %5 = tpu.concatenate %3, %4 in 0 : vector<8x32xf32>, vector<8x32xf32> -> vector<16x32xf32>
    %c0_7 = arith.constant 0 : index
    %c0_8 = arith.constant 0 : index
    %6 = vector.load %arg5[%c0_7, %c0_8] : memref<32x32xf32, #tpu.memory_space<vmem>>, vector<32x32xf32>
    %cst = arith.constant dense<0.000000e+00> : vector<16x32xf32>
    %7 = tpu.matmul %2, %6, %cst {dimension_numbers = #tpu.dot_dimension_numbers<[1], [0], [0], [1], [0, 0, 1, 1], [], []>} : vector<16x32xf32>, vector<32x32xf32>, vector<16x32xf32> -> vector<16x32xf32>
    %c0_9 = arith.constant 0 : index
    %c0_10 = arith.constant 0 : index
    %8 = vector.load %arg6[%c0_9, %c0_10] : memref<32x32xf32, #tpu.memory_space<vmem>>, vector<32x32xf32>
    %cst_11 = arith.constant dense<0.000000e+00> : vector<16x32xf32>
    %9 = tpu.matmul %5, %8, %cst_11 {dimension_numbers = #tpu.dot_dimension_numbers<[1], [0], [0], [1], [0, 0, 1, 1], [], []>} : vector<16x32xf32>, vector<32x32xf32>, vector<16x32xf32> -> vector<16x32xf32>
    %10 = arith.addf %7, %9 : vector<16x32xf32>
    %cst_12 = arith.constant 0.000000e+00 : f32
    %11 = vector.broadcast %cst_12 : f32 to vector<16x32xf32>
    %12 = arith.maximumf %10, %11 : vector<16x32xf32>
    %13 = vector.extract_strided_slice %12 {offsets = [0, 0], sizes = [8, 32], strides = [1, 1]} : vector<16x32xf32> to vector<8x32xf32>
    %14 = vector.extract_strided_slice %12 {offsets = [8, 0], sizes = [8, 32], strides = [1, 1]} : vector<16x32xf32> to vector<8x32xf32>
    %15 = arith.minimumf %13, %14 : vector<8x32xf32>
    %c0_13 = arith.constant 0 : index
    %c0_14 = arith.constant 0 : index
    %16 = vector.load %arg7[%c0_13, %c0_14] : memref<32x32xf32, #tpu.memory_space<vmem>>, vector<32x32xf32>
    %cst_15 = arith.constant dense<0.000000e+00> : vector<8x32xf32>
    %17 = tpu.matmul %15, %16, %cst_15 {dimension_numbers = #tpu.dot_dimension_numbers<[1], [0], [0], [1], [0, 0, 1, 1], [], []>} : vector<8x32xf32>, vector<32x32xf32>, vector<8x32xf32> -> vector<8x32xf32>
    %c0_16 = arith.constant 0 : index
    %c0_17 = arith.constant 0 : index
    %18 = vector.load %arg8[%c0_16, %c0_17] : memref<8x32xf32, #tpu.memory_space<vmem>>, vector<8x32xf32>
    tpu.vector_store %arg8[%c0_16, %c0_17], %17 {strides = array<i32>} : memref<8x32xf32, #tpu.memory_space<vmem>>, vector<8x32xf32>,
    return
  }
  func.func @transform_0(%arg0: i32) -> (i32, i32) {
    %c0_i32 = arith.constant 0 : i32
    %c0_i32_0 = arith.constant 0 : i32
    return %arg0, %c0_i32 : i32, i32
  }
  func.func @transform_1(%arg0: i32) -> (i32, i32) {
    %c0_i32 = arith.constant 0 : i32
    %c0_i32_0 = arith.constant 0 : i32
    return %arg0, %c0_i32 : i32, i32
  }
  func.func @transform_2(%arg0: i32) -> (i32, i32) {
    %c0_i32 = arith.constant 0 : i32
    %c0_i32_0 = arith.constant 0 : i32
    return %arg0, %c0_i32 : i32, i32
  }
  func.func @transform_3(%arg0: i32) -> (i32, i32) {
    %c0_i32 = arith.constant 0 : i32
    %c0_i32_0 = arith.constant 0 : i32
    return %arg0, %c0_i32 : i32, i32
  }
  func.func @transform_4(%arg0: i32) -> (i32, i32) {
    %c0_i32 = arith.constant 0 : i32
    %c0_i32_0 = arith.constant 0 : i32
    %c0_i32_1 = arith.constant 0 : i32
    return %c0_i32, %c0_i32_0 : i32, i32
  }
  func.func @transform_5(%arg0: i32) -> (i32, i32) {
    %c0_i32 = arith.constant 0 : i32
    %c0_i32_0 = arith.constant 0 : i32
    %c0_i32_1 = arith.constant 0 : i32
    return %c0_i32, %c0_i32_0 : i32, i32
  }
  func.func @transform_6(%arg0: i32) -> (i32, i32) {
    %c0_i32 = arith.constant 0 : i32
    %c0_i32_0 = arith.constant 0 : i32
    %c0_i32_1 = arith.constant 0 : i32
    return %c0_i32, %c0_i32_0 : i32, i32
  }
  func.func @transform_7(%arg0: i32) -> (i32, i32) {
    %c0_i32 = arith.constant 0 : i32
    %c0_i32_0 = arith.constant 0 : i32
    return %arg0, %c0_i32 : i32, i32
  }
}

</mosaic_0001>

<bundles_post_ra>
// kernel: offset_set_forward.1
= control target key start
LH: loop header
LB: loop body
LE: loop exit
PB: predicated region body
PF: predicated region fallthrough
CT: control target
= control target key end

     0   :  { %vm39_vm0 = vcmask 261120   ;;  %v404_v6 = vmov 0.0|0.0   ;;  %s514_s0 = inlined_call_operand.vmem [shape: f32[8,32], index: 0, kind: input, shape index: {}]   ;;  %s515_s1 = inlined_call_operand.vmem [shape: f32[8,32], index: 1, kind: input, shape index: {}]   ;;  %s516_s2 = inlined_call_operand.vmem [shape: f32[8,32], index: 2, kind: input, shape index: {}]   ;;  %s517_s3 = inlined_call_operand.vmem [shape: f32[8,32], index: 3, kind: input, shape index: {}]   ;;  %s518_s4 = inlined_call_operand.vmem [shape: f32[32,32], index: 4, kind: input, shape index: {}]   ;;  %s519_s5 = inlined_call_operand.vmem [shape: f32[32,32], index: 5, kind: input, shape index: {}]   ;;  %s520_s6 = inlined_call_operand.vmem [shape: f32[32,32], index: 6, kind: input, shape index: {}]   ;;  %s521_s7 = inlined_call_operand.hbm [shape: f32[8,32], index: 7, kind: output, shape index: {}]  }
   0x1   :  { %v35_v0 = vld [vmem:[%s519_s5] sm:$0xff]  ;;  %v36_v1 = vld [vmem:[%s519_s5 + $0x8] sm:$0xff]  ;;  %v37_v2 = vld [vmem:[%s519_s5 + $0x10] sm:$0xff]  ;;  %368 = vmatprep.subr.bf16.mxu1 %v404_v6 }
   0x2   :  { %v352_v3 = vpack.c.bf16 %v36_v1, %v35_v0  ;;  %v38_v4 = vld [vmem:[%s519_s5 + $0x18] sm:$0xff]  ;;  %v29_v5 = vld [vmem:[%s516_s2] sm:$0xff]  ;;  %v32_v9 = vld [vmem:[%s518_s4 + $0x8] sm:$0xff] }
   0x3   :  { %v356_v7 = vpack.c.bf16 %v38_v4, %v37_v2  ;;  %327 = vmatprep.mubr.msk.f32.mxu0 %vm39_vm0, %v29_v5  ;;  %v31_v8 = vld [vmem:[%s518_s4] sm:$0xff]  ;;  %v206_v11 = vld [vmem:[%s520_s6 + $0x8] sm:$0xff] }
   0x4   :  { %353 = vmatprep.subr.bf16.mxu0 %v352_v3  ;;  %v205_v10 = vld [vmem:[%s520_s6] sm:$0xff] }
   0x5   :  { %355 = vmatpush3.bf16.msra.mxu0 %v352_v3 }
   0x6   :  { %12 = vsyncpa [#allocation3], 0  ;;  %357 = vmatprep.subr.bf16.mxu0 %v356_v7  ;;  %v360_v12 = vpack.c.bf16 %v32_v9, %v31_v8  ;;  %v369_v13 = vpack.c.bf16 %v206_v11, %v205_v10  ;;  %v33_v14 = vld [vmem:[%s518_s4 + $0x10] sm:$0xff]  ;;  %v34_v15 = vld [vmem:[%s518_s4 + $0x18] sm:$0xff]  ;;  %vm405_vm1 = vmmov 0   ;;  %v406_v23 = vmov 0.0  }
   0x7   :  { %v30_v16 = vld [vmem:[%s517_s3] sm:$0xff]  ;;  %v364_v17 = vpack.c.bf16 %v34_v15, %v33_v14  ;;  %v207_v20 = vld [vmem:[%s520_s6 + $0x10] sm:$0xff]  ;;  %v208_v21 = vld [vmem:[%s520_s6 + $0x18] sm:$0xff]  ;;  %349 = vmatprep.mubr.msk.f32.mxu1 %vm405_vm1, %v406_v23 }
   0x8   :  { %370 = vmatpush3.bf16.msra.mxu1 %v369_v13  ;;  %v27_v18 = vld [vmem:[%s514_s0] sm:$0xff]  ;;  %v372_v22 = vpack.c.bf16 %v208_v21, %v207_v20  ;;  %s407_s0 = smov [#allocation2]  }
   0x9   :  { %359 = vmatpush3.bf16.msra.mxu0 %v356_v7  ;;  %371 = vmatprep.subr.bf16.mxu1 %v404_v6  ;;  %v28_v19 = vld [vmem:[%s515_s1] sm:$0xff]  ;;  %s289_s1 = sshll.u32 %s407_s0, 4  ;;  %s290_s1 = int_to_ptr.vmem [resolvable:$true] %s289_s1 }
   0xa   :  { %361 = vmatprep.subr.bf16.mxu0 %v360_v12  ;;  %s380_s6 = scalar_lea.vmem %s290_s1, 128  ;;  %p385_p1 = scmp.lt.s32.totalorder %s290_s1, %s290_s1 }
   0xb   :  { %p381_p0 = scmp.ne.s32.totalorder %s290_s1, %s380_s6  ;;  %p386_p2 = scmp.lt.s32.totalorder %s380_s6, %s380_s6 }
   0xc   :  { %328 = vmatmul.mubr.msk.f32.vlgmr.msra.gmra.mrb[0].mxu0 %vm39_vm0, %v30_v16  ;;  %373 = vmatpush3.bf16.msra.mxu1 %v372_v22 }
   0xd   :  { %363 = vmatpush3.bf16.msra.mxu0 %v360_v12  ;;  %338 = vmatprep.mubr.msk.f32.mxu0 %vm39_vm0, %v27_v18  ;;  %p387_p3 = por %p386_p2, %p385_p1 }
   0xe   :  { %365 = vmatprep.subr.bf16.mxu0 %v364_v17 }
   0xf   :  { %p388_p4 = pnand %p387_p3, %p381_p0 }
  0x11   :  { %367 = vmatpush3.bf16.msra.mxu0 %v364_v17 }
  0x14   :  { %339 = vmatmul.mubr.msk.f32.vlgmr.msra.gmra.mrb[0].mxu0 %vm39_vm0, %v28_v19 }
  0xe7   :  { %v340_v24 = vpop.f32.mrb[0].mxu0 }
  0xe8   :  { %v203_v25 = vmax.f32 %v340_v24, 0.0  ;;  %v193_v26 = vpop.f32.mrb[1].mxu0 }
  0xe9   :  { %v202_v27 = vmax.f32 %v193_v26, 0.0 }
  0xeb   :  { %v204_v28 = vmin.f32 %v202_v27, %v203_v25 }
  0xed   :  { %350 = vmatmul.mubr.msk.f32.vlgmr.msra.gmra.mrb[0].mxu1 %vm39_vm0, %v204_v28 }
 0x1c0   :  { %v278_v29 = vpop.f32.mrb[0].mxu1 }
 0x1c1   :  { %282 = vst.msk [vmem:[#allocation2] sm:$0xff] %vm39_vm0, %v278_v29  ;;  %v351_v30 = vpop.f32.mrb[1].mxu1 }
 0x1c2   :  { %391 = shalt.err (!%p388_p4)
}
 0x1c3   :  { %s392_s8 = scalar_lea.hbm %s521_s7, 128 }
 0x1c4   :  { %p393_p5 = scmp.ne.s32.totalorder %s521_s7, %s392_s8  ;;  %p396_p6 = scmp.lt.u32.totalorder %s392_s8, %s521_s7 }
 0x1c6   :  { %p398_p7 = pnand %p396_p6, %p393_p5 }
 0x1c8   :  { %401 = shalt.err (!%p398_p7)
}
 0x1c9   :  { %292 = dma.vmem_to_hbm [thread:$0]  %s290_s1, 128, %s521_s7, [#allocation3]  }
 0x1ca   :  { %402 = dma.done.wait [#allocation3], 128  }
 0x1cb   :  { %403 = vsyncadd [#allocation3], 4294967168 }
 0x1cc   :  { %296 = vsyncpa [#allocation3], 1 }

</bundles_post_ra>
